<compile_context>
chip_gen: v6e
topology: v6e:2x2x1
jax: 0.10.0
libtpu: 0.0.40
codegen_flags: <defaults>
</compile_context>

<pallas_src>
import functools

import jax
import jax.numpy as jnp
from jax.experimental import pallas as pl
from jax.experimental.pallas import tpu as pltpu

EPS = 1e-05

# Tile selection budgets against the smallest comfortable scoped-VMEM across generations; the
# explicit compiler limit is raised to 32 MiB (> v5e's 16 MiB default, < v7x's 64 MiB physical).
_VMEM_TILE_BUDGET = 12 * 1024 * 1024
_VMEM_LIMIT_BYTES = 32 * 1024 * 1024


def _stable_ce_kernel(logits_ref, labels_ref, out_ref, *, n_total, tile_n):
    """One batch tile.

    logits_ref: (C, TILE_N) — batch on lanes, classes on sublanes (lane-dense for small C)
    labels_ref: (1, TILE_N) int32
    out_ref:    (1, 8, 128) f32 — this tile's partial NLL sum lives at [0, 0, 0], zeros elsewhere
    """
    i = pl.program_id(0)

    logits = logits_ref[...].astype(jnp.float32)   # cast on-chip; bf16 stays bf16 in HBM/DMA
    labels = labels_ref[...]                       # (1, TILE_N) int32

    # Numerically-stable softmax pieces, reduced over the short class/sublane axis.
    m = jnp.max(logits, axis=0, keepdims=True)                         # (1, TILE_N)
    e = jnp.exp(logits - m)                                            # (C, TILE_N): N*C exps total
    denom = jnp.sum(e, axis=0, keepdims=True)                          # (1, TILE_N)

    # Pick the label's unnormalized prob: one-hot select over classes + sublane sum.
    cls = jax.lax.broadcasted_iota(jnp.int32, logits.shape, 0)         # class index per sublane
    e_label = jnp.sum(jnp.where(cls == labels, e, 0.0),
                      axis=0, keepdims=True)                           # (1, TILE_N)

    # picked = log(softmax(x)[label] + eps) == log(e_label/denom + eps): log+div per row only.
    picked = jnp.log(e_label / denom + EPS)                            # (1, TILE_N)

    # Mask batch columns past the true batch size.  Padded columns of the last tile read garbage,
    # but every column's reduction is independent and masked *before* the tile-level sum.
    col = i * tile_n + jax.lax.broadcasted_iota(jnp.int32, picked.shape, 1)
    picked = jnp.where(col < n_total, picked, 0.0)

    # Per-tile partial NLL sum.  Distinct, fully-aligned (8,128) output block per grid step ->
    # safe under "parallel" (megacore); no read-modify-write accumulator; mean divide is done
    # once in the wrapper.
    partial = -jnp.sum(picked)
    r = jax.lax.broadcasted_iota(jnp.int32, out_ref.shape, 1)
    c = jax.lax.broadcasted_iota(jnp.int32, out_ref.shape, 2)
    out_ref[...] = jnp.where((r == 0) & (c == 0), partial, 0.0)


def _pick_tile_n(n, c, dtype_bytes):
    """Largest batch-tile (lane) width that fits the VMEM budget."""
    # Per batch column: double-buffered logits input (2*C*dtype) + double-buffered labels (2*4B)
    # + ~4 f32 (C,) intermediates (cast copy, e, one-hot select, iota) + small row vectors.
    per_col = 2 * c * dtype_bytes + 8 + 16 * c + 64
    max_cols = _VMEM_TILE_BUDGET // per_col
    if max_cols < 128:
        # TODO(synk): C-grid online-softmax path for vocab-scale class counts.
        raise NotImplementedError("class count too large for single-C-block layout")
    if n <= max_cols:
        return n                       # single full-extent tile (amortizes per-step overhead)
    return (max_cols // 128) * 128     # lane axis must stay a multiple of 128


def stable_cross_entropy_loss(outputs, labels, *, tile_n=None):
    """outputs: (N, C) float (f32 or bf16), labels: (N,) int — returns scalar mean loss (f32)."""
    n, c = outputs.shape
    dtype_bytes = jnp.dtype(outputs.dtype).itemsize

    if tile_n is None:
        tile_n = _pick_tile_n(n, c, dtype_bytes)
    tile_n = int(tile_n)
    if tile_n >= n:
        tile_n = n                                        # full extent — any width allowed
    else:
        tile_n = max(128, ((tile_n + 127) // 128) * 128)  # partial tiles must be lane-aligned
    num_tiles = pl.cdiv(n, tile_n)

    # Layout plumbing: batch on lanes, classes on sublanes (fixes ~8% lane occupancy for C=10).
    logits_t = outputs.T                                  # (C, N)
    labels2d = labels.astype(jnp.int32).reshape(1, n)     # (1, N)

    kernel = functools.partial(_stable_ce_kernel, n_total=n, tile_n=tile_n)

    cost = pl.CostEstimate(
        flops=6 * n * c,                                   # max, sub, sum, select, compare
        transcendentals=n * c + n,                         # exp over (N,C) + log over (N,)
        bytes_accessed=n * c * dtype_bytes + n * 4 + num_tiles * 8 * 128 * 4,
    )

    partials = pl.pallas_call(
        kernel,
        out_shape=jax.ShapeDtypeStruct((num_tiles, 8, 128), jnp.float32),
        grid_spec=pltpu.PrefetchScalarGridSpec(
            num_scalar_prefetch=0,
            grid=(num_tiles,),
            in_specs=[
                pl.BlockSpec((c, tile_n), lambda i: (0, i)),
                pl.BlockSpec((1, tile_n), lambda i: (0, i)),
            ],
            out_specs=pl.BlockSpec((1, 8, 128), lambda i: (i, 0, 0)),
        ),
        compiler_params=pltpu.CompilerParams(
            dimension_semantics=("parallel",),             # independent per-tile partials
            vmem_limit_bytes=_VMEM_LIMIT_BYTES,
        ),
        cost_estimate=cost,
    )(logits_t, labels2d)

    # Single mean divide outside the kernel; only element [i,0,0] of each slab is non-zero.
    return jnp.sum(partials) / jnp.float32(n)


def _reference(outputs, labels):
    # Pure-JAX reference mirroring the PyTorch module.
    p = jax.nn.softmax(outputs.astype(jnp.float32), axis=-1)
    logp = jnp.log(p + EPS)
    picked = jnp.take_along_axis(logp, labels[:, None].astype(jnp.int32), axis=-1)[:, 0]
    return -jnp.mean(picked)


if __name__ == "__main__":
    key = jax.random.PRNGKey(0)
    k1, k2, k3, k4 = jax.random.split(key, 4)

    # Case 1: MNIST-like logits, single full-extent tile (batch=8, 10 classes), f32.
    N, C = 8, 10
    outputs = jax.random.normal(k1, (N, C), dtype=jnp.float32)
    labels = jax.random.randint(k2, (N,), 0, C, dtype=jnp.int32)

    loss = jax.block_until_ready(stable_cross_entropy_loss(outputs, labels))
    ref = _reference(outputs, labels)
    assert jnp.allclose(loss, ref, atol=1e-5, rtol=1e-5), (loss, ref)

    # Case 2: multi-tile parallel path with a non-divisible batch (exercises lane-aligned 128-wide
    # tiles, padding-column masking, and per-tile partial outputs), bf16 logits read on-chip.
    N2, C2 = 300, 10
    outputs2 = jax.random.normal(k3, (N2, C2), dtype=jnp.bfloat16)
    labels2 = jax.random.randint(k4, (N2,), 0, C2, dtype=jnp.int32)

    loss2 = jax.block_until_ready(stable_cross_entropy_loss(outputs2, labels2, tile_n=128))
    ref2 = _reference(outputs2, labels2)
    assert jnp.allclose(loss2, ref2, atol=1e-4, rtol=1e-4), (loss2, ref2)

    print("KERNEL_OK")
</pallas_src>

<mosaic_0001>
module attributes {stable_mosaic.version = 11 : i64} {
  func.func @_stable_ce_kernel(%arg0: i32, %arg1: memref<10x8xf32, #tpu.memory_space<vmem>>, %arg2: memref<1x8xi32, #tpu.memory_space<vmem>>, %arg3: memref<1x8x128xf32, #tpu.memory_space<vmem>>) attributes {dimension_semantics = [#tpu.dimension_semantics<parallel>], iteration_bounds = array<i64: 1>, scalar_prefetch = 0 : i64, scratch_operands = 0 : i64, tpu.core_type = #tpu.core_type<tc>, window_params = [{transform_indices = @transform_0, window_bounds = array<i64: 10, 8>}, {transform_indices = @transform_1, window_bounds = array<i64: 1, 8>}, {transform_indices = @transform_2, window_bounds = array<i64: 1, 8, 128>}]} {
    %c0 = arith.constant 0 : index
    %c0_0 = arith.constant 0 : index
    %0 = vector.load %arg1[%c0, %c0_0] : memref<10x8xf32, #tpu.memory_space<vmem>>, vector<10x8xf32>
    %c0_1 = arith.constant 0 : index
    %c0_2 = arith.constant 0 : index
    %1 = vector.load %arg2[%c0_1, %c0_2] : memref<1x8xi32, #tpu.memory_space<vmem>>, vector<1x8xi32>
    %cst = arith.constant dense<0xFF800000> : vector<8xf32>
    %2 = vector.multi_reduction <maximumf>, %0, %cst [0] : vector<10x8xf32> to vector<8xf32>
    %3 = vector.shape_cast %2 : vector<8xf32> to vector<1x8xf32>
    %4 = vector.broadcast %3 : vector<1x8xf32> to vector<10x8xf32>
    %5 = arith.subf %0, %4 : vector<10x8xf32>
    %6 = math.exp %5 : vector<10x8xf32>
    %cst_3 = arith.constant dense<0.000000e+00> : vector<8xf32>
    %7 = vector.multi_reduction <add>, %6, %cst_3 [0] : vector<10x8xf32> to vector<8xf32>
    %8 = vector.shape_cast %7 : vector<8xf32> to vector<1x8xf32>
    %9 = tpu.iota {dimensions = array<i32: 0>} : vector<10x8xi32>
    %10 = vector.broadcast %1 : vector<1x8xi32> to vector<10x8xi32>
    %11 = arith.cmpi eq, %9, %10 : vector<10x8xi32>
    %cst_4 = arith.constant 0.000000e+00 : f32
    %12 = vector.broadcast %cst_4 : f32 to vector<10x8xf32>
    %13 = arith.select %11, %6, %12 : vector<10x8xi1>, vector<10x8xf32>
    %cst_5 = arith.constant dense<0.000000e+00> : vector<8xf32>
    %14 = vector.multi_reduction <add>, %13, %cst_5 [0] : vector<10x8xf32> to vector<8xf32>
    %15 = vector.shape_cast %14 : vector<8xf32> to vector<1x8xf32>
    %16 = arith.divf %15, %8 : vector<1x8xf32>
    %cst_6 = arith.constant 9.99999974E-6 : f32
    %17 = vector.broadcast %cst_6 : f32 to vector<1x8xf32>
    %18 = arith.addf %16, %17 : vector<1x8xf32>
    %19 = math.log %18 : vector<1x8xf32>
    %c8_i32 = arith.constant 8 : i32
    %20 = arith.muli %arg0, %c8_i32 : i32
    %21 = tpu.iota {dimensions = array<i32: 1>} : vector<1x8xi32>
    %22 = vector.broadcast %20 : i32 to vector<1x8xi32>
    %23 = arith.addi %22, %21 : vector<1x8xi32>
    %c8_i32_7 = arith.constant 8 : i32
    %24 = vector.broadcast %c8_i32_7 : i32 to vector<1x8xi32>
    %25 = arith.cmpi slt, %23, %24 : vector<1x8xi32>
    %cst_8 = arith.constant 0.000000e+00 : f32
    %26 = vector.broadcast %cst_8 : f32 to vector<1x8xf32>
    %27 = arith.select %25, %19, %26 : vector<1x8xi1>, vector<1x8xf32>
    %28 = vector.shape_cast %27 : vector<1x8xf32> to vector<1x1x8xf32>
    %cst_9 = arith.constant dense<0.000000e+00> : vector<1xf32>
    %29 = vector.multi_reduction <add>, %28, %cst_9 [1, 2] : vector<1x1x8xf32> to vector<1xf32>
    %30 = vector.shape_cast %29 : vector<1xf32> to vector<1x1x1xf32>
    %31 = vector.extract %30[0, 0, 0] : f32 from vector<1x1x1xf32>
    %cst_10 = arith.constant 0.000000e+00 : f32
    %32 = arith.subf %cst_10, %31 : f32
    %33 = tpu.iota {dimensions = array<i32: 1>} : vector<1x8x128xi32>
    %34 = tpu.iota {dimensions = array<i32: 2>} : vector<1x8x128xi32>
    %c0_i32 = arith.constant 0 : i32
    %35 = vector.broadcast %c0_i32 : i32 to vector<1x8x128xi32>
    %36 = arith.cmpi eq, %33, %35 : vector<1x8x128xi32>
    %c0_i32_11 = arith.constant 0 : i32
    %37 = vector.broadcast %c0_i32_11 : i32 to vector<1x8x128xi32>
    %38 = arith.cmpi eq, %34, %37 : vector<1x8x128xi32>
    %39 = arith.andi %36, %38 : vector<1x8x128xi1>
    %cst_12 = arith.constant 0.000000e+00 : f32
    %40 = vector.broadcast %32 : f32 to vector<1x8x128xf32>
    %41 = vector.broadcast %cst_12 : f32 to vector<1x8x128xf32>
    %42 = arith.select %39, %40, %41 : vector<1x8x128xi1>, vector<1x8x128xf32>
    %c0_13 = arith.constant 0 : index
    %c0_14 = arith.constant 0 : index
    %c0_15 = arith.constant 0 : index
    %43 = vector.load %arg3[%c0_13, %c0_14, %c0_15] : memref<1x8x128xf32, #tpu.memory_space<vmem>>, vector<1x8x128xf32>
    tpu.vector_store %arg3[%c0_13, %c0_14, %c0_15], %42 {strides = array<i32>} : memref<1x8x128xf32, #tpu.memory_space<vmem>>, vector<1x8x128xf32>,
    return
  }
  func.func @transform_0(%arg0: i32) -> (i32, i32) {
    %c0_i32 = arith.constant 0 : i32
    %c0_i32_0 = arith.constant 0 : i32
    return %c0_i32, %arg0 : i32, i32
  }
  func.func @transform_1(%arg0: i32) -> (i32, i32) {
    %c0_i32 = arith.constant 0 : i32
    %c0_i32_0 = arith.constant 0 : i32
    return %c0_i32, %arg0 : i32, i32
  }
  func.func @transform_2(%arg0: i32) -> (i32, i32, i32) {
    %c0_i32 = arith.constant 0 : i32
    %c0_i32_0 = arith.constant 0 : i32
    %c0_i32_1 = arith.constant 0 : i32
    return %arg0, %c0_i32, %c0_i32_0 : i32, i32, i32
  }
}

</mosaic_0001>

<bundles_post_ra>
// kernel: tpu_custom_call.1
= control target key start
LH: loop header
LB: loop body
LE: loop exit
PB: predicated region body
PF: predicated region fallthrough
CT: control target
= control target key end

     0   :  { %vm15_vm0 = vcmask 64512   ;;  %vm17_vm1 = vcmask 58368   ;;  %s173_s0 = inlined_call_operand.vmem [shape: f32[10,8], index: 0, kind: input, shape index: {}]   ;;  %s174_s1 = inlined_call_operand.vmem [shape: s32[1,8], index: 1, kind: input, shape index: {}]   ;;  %s175_s2 = inlined_call_operand.hbm [shape: f32[1,8,128], index: 2, kind: output, shape index: {}]  }
   0x1   :  { %v12_v0 = vld [vmem:[%s173_s0] sm:$0xff]  ;;  %v13_v1 = vld [vmem:[%s173_s0 + $0x8] sm:$0x3] }
   0x2   :  { %v16_v2 = vsel %vm15_vm0, %v12_v0, -inf }
   0x3   :  { %7 = vsyncpa [#allocation3], 0  ;;  %v18_v3 = vsel %vm17_vm1, %v13_v1, -inf  ;;  %v41_v15 = vlaneseq  ;;  %v105_v17 = vld [vmem:[%s174_s1] ss:$0 sm:$0xff]  ;;  %vm73_vm5 = vcmask 57344  }
   0x4   :  { %v19_v4 = vmax.f32 %v16_v2, %v18_v3  ;;  %s139_s14 = smov [#allocation2]  }
   0x5   :  { %v42_v16 = vshrl.u32 %v41_v15, 7  ;;  %v68_v44 = vand.u32 127, %v41_v15  ;;  %s97_s15 = sshll.u32 %s139_s14, 4  ;;  %s98_s15 = int_to_ptr.vmem [resolvable:$true] %s97_s15 }
   0x6   :  { %v20_v5 = vrot.slane %v19_v4, 4  ;;  %s117_s17 = scalar_lea.vmem %s98_s15, 128  ;;  %p122_p1 = scmp.lt.s32.totalorder %s98_s15, %s98_s15 }
   0x7   :  { %v43_v18 = vadd.s32 8, %v42_v16  ;;  %vm48_vm2 = vcmp.eq.s32.totalorder %v42_v16, %v105_v17  ;;  %vm71_vm4 = vcmp.lt.s32.totalorder %v68_v44, 8  ;;  %vm85_vm6 = vcmp.eq.s32.totalorder %v42_v16, 0  ;;  %p118_p0 = scmp.ne.s32.totalorder %s98_s15, %s117_s17  ;;  %p123_p2 = scmp.lt.s32.totalorder %s117_s17, %s117_s17 }
   0x8   :  { %v21_v6 = vmax.f32 %v19_v4, %v20_v5  ;;  %vm86_vm7 = vcmp.eq.s32.totalorder %v68_v44, 0 }
   0x9   :  { %vm49_vm3 = vcmp.eq.s32.totalorder %v43_v18, %v105_v17  ;;  %vm87_vm8 = vmand %vm85_vm6, %vm86_vm7  ;;  %p124_p3 = por %p123_p2, %p122_p1 }
   0xa   :  { %v22_v7 = vrot.slane %v21_v6, 2 }
   0xb   :  { %p125_p4 = pnand %p124_p3, %p118_p0 }
   0xc   :  { %v23_v8 = vmax.f32 %v21_v6, %v22_v7 }
   0xe   :  { %v24_v9 = vrot.slane %v23_v8, 1 }
  0x10   :  { %v25_v10 = vmax.f32 %v23_v8, %v24_v9 }
  0x12   :  { %v26_v11 = vsub.f32 %v12_v0, %v25_v10  ;;  %v27_v12 = vsub.f32 %v13_v1, %v25_v10 }
  0x14   :  { %v28_v13 = vmul.f32 1.442695, %v26_v11  ;;  %v30_v14 = vmul.f32 1.442695, %v27_v12 }
  0x16   :  { %109 = vpow2.f32 %v28_v13 }
  0x17   :  { %111 = vpow2.f32 %v30_v14 }
  0x23   :  { %v110_v19 = vpop.eup %109 }
  0x24   :  { %v112_v20 = vpop.eup %111  ;;  %v32_v21 = vsel %vm15_vm0, %v110_v19, 0.0  ;;  %v50_v22 = vsel %vm48_vm2, %v110_v19, 0.0 }
  0x25   :  { %v33_v23 = vsel %vm17_vm1, %v112_v20, 0.0  ;;  %v51_v24 = vsel %vm49_vm3, %v112_v20, 0.0  ;;  %v52_v25 = vsel %vm15_vm0, %v50_v22, 0.0 }
  0x26   :  { %v34_v26 = vadd.f32 %v33_v23, %v32_v21  ;;  %v53_v27 = vsel %vm17_vm1, %v51_v24, 0.0 }
  0x27   :  { %v54_v28 = vadd.f32 %v53_v27, %v52_v25 }
  0x28   :  { %v35_v29 = vrot.slane %v34_v26, 4 }
  0x29   :  { %v55_v31 = vrot.slane %v54_v28, 4 }
  0x2a   :  { %v36_v30 = vadd.f32 %v35_v29, %v34_v26 }
  0x2b   :  { %v56_v34 = vadd.f32 %v55_v31, %v54_v28 }
  0x2c   :  { %v37_v32 = vrot.slane %v36_v30, 2 }
  0x2d   :  { %v57_v37 = vrot.slane %v56_v34, 2 }
  0x2e   :  { %v38_v33 = vadd.f32 %v37_v32, %v36_v30 }
  0x2f   :  { %v58_v38 = vadd.f32 %v57_v37, %v56_v34 }
  0x30   :  { %v39_v35 = vrot.slane %v38_v33, 1 }
  0x31   :  { %v59_v39 = vrot.slane %v58_v38, 1 }
  0x32   :  { %v40_v36 = vadd.f32 %v39_v35, %v38_v33 }
  0x33   :  { %v60_v40 = vadd.f32 %v59_v39, %v58_v38 }
  0x34   :  { %113 = vrcp.f32 %v40_v36 }
  0x41   :  { %v114_v41 = vpop.eup %113 }
  0x42   :  { %v62_v42 = vmul.f32 %v114_v41, %v60_v40 }
  0x44   :  { %v63_v43 = vadd.f32 1e-05, %v62_v42 }
  0x46   :  { %115 = vlog2.f32 %v63_v43 }
  0x53   :  { %v116_v45 = vpop.eup %115 }
  0x54   :  { %v65_v46 = vmul.f32 0.6931472, %v116_v45 }
  0x56   :  { %v72_v47 = vsel %vm71_vm4, %v65_v46, 0.0 }
  0x57   :  { %v74_v48 = vsel %vm73_vm5, %v72_v47, 0.0 }
  0x58   :  { %75 = vadd.xlane.f32.xlu0 %v74_v48 }
  0xe1   :  { %v76_v49 = vpop.xlane.xlu0 %75 }
  0xe2   :  { %v77_v50 = vrot.slane %v76_v49, 4 }
  0xe4   :  { %v78_v51 = vadd.f32 %v77_v50, %v76_v49 }
  0xe6   :  { %v79_v52 = vrot.slane %v78_v51, 2 }
  0xe8   :  { %v80_v53 = vadd.f32 %v79_v52, %v78_v51 }
  0xea   :  { %v81_v54 = vrot.slane %v80_v53, 1 }
  0xec   :  { %v82_v55 = vadd.f32 %v81_v54, %v80_v53 }
  0xee   :  { %106 = vpush %v82_v55 }
 0x11f   :  { %s107_s1 = spop %106 }
 0x120   :  { %s84_s16 = ssub.f32 0.0, %s107_s1 }
 0x122   :  { %v88_v56 = vstv %s84_s16 }
 0x123   :  { %v89_v57 = vsel %vm87_vm8, %v88_v56, 0.0 }
 0x124   :  { %90 = vst [vmem:[#allocation2] sm:$0xff] %v89_v57 }
 0x125   :  { %128 = shalt.err (!%p125_p4)
}
 0x126   :  { %100 = dma.vmem_to_hbm [thread:$0]  %s98_s15, 128, %s175_s2, [#allocation3]  }
 0x127   :  { %137 = dma.done.wait [#allocation3], 128  }
 0x128   :  { %138 = vsyncadd [#allocation3], 4294967168 }
 0x129   :  { %104 = vsyncpa [#allocation3], 1 }

</bundles_post_ra>
